<compile_context>
chip_gen: v5e
topology: v5e:2x2
jax: 0.10.0
libtpu: 0.0.40
codegen_flags: <defaults>
</compile_context>

<pallas_src>
import functools
import math

import jax
import jax.numpy as jnp
from jax.experimental import pallas as pl
from jax.experimental.pallas import tpu as pltpu

_TM_MAX = 512                      # row tile for large-M matmuls
_VMEM_LIMIT = 64 * 1024 * 1024     # budget fits v7x (64 MiB) and raises v5e default


# ----------------------------- Pallas kernels -----------------------------

def _mm_bias_kernel(*refs, act, has_skip):
    """(TM,K)@(K,N) bf16 matmul, f32 accumulate, +bias (+skip) (+ReLU)."""
    if has_skip:
        x_ref, w_ref, b_ref, s_ref, o_ref = refs
    else:
        x_ref, w_ref, b_ref, o_ref = refs
    acc = jnp.dot(x_ref[...], w_ref[...], preferred_element_type=jnp.float32)
    y = acc + b_ref[...]
    if has_skip:
        y = y + s_ref[...].astype(jnp.float32)
    if act:
        y = jnp.maximum(y, 0.0)
    o_ref[...] = y.astype(o_ref.dtype)


def _conv3x3_kernel(x_ref, w_ref, b_ref, o_ref, *, ho, wo, act):
    """3x3 stride-1 conv for one image: in-VMEM tap gather + 9 MXU matmuls.

    x_ref: (1, Hp, Wp, C) bf16 (spatially padded), w_ref: (9, C, Cout) bf16
    (BN scale folded), b_ref: (1, Cout) f32, o_ref: (1, Ho*Wo, Cout) bf16.
    """
    xv = x_ref[...]                      # (1, Hp, Wp, C)
    wv = w_ref[...]                      # (9, C, Cout)
    cin = xv.shape[3]
    cout = wv.shape[2]
    acc = jnp.zeros((ho * wo, cout), jnp.float32)
    for i in range(3):
        for j in range(3):
            win = xv[0, i:i + ho, j:j + wo, :].reshape(ho * wo, cin)
            acc = acc + jnp.dot(win, wv[i * 3 + j],
                                preferred_element_type=jnp.float32)
    y = acc + b_ref[...]
    if act:
        y = jnp.maximum(y, 0.0)
    o_ref[...] = y[None].astype(o_ref.dtype)


# ----------------------------- Pallas wrappers -----------------------------

def matmul_bias(x2d, w, bias, *, act, skip=None, out_dtype=jnp.bfloat16):
    """(M,K)@(K,N) + bias (+skip) (+ReLU). bias f32 (N,), skip (M,N)."""
    m, k = x2d.shape
    n = w.shape[1]
    tm = m if m <= _TM_MAX else _TM_MAX
    mp = ((m + tm - 1) // tm) * tm
    if mp != m:  # cold fallback for ragged large M (never hit at demo shapes)
        x2d = jnp.pad(x2d, ((0, mp - m), (0, 0)))
        if skip is not None:
            skip = jnp.pad(skip, ((0, mp - m), (0, 0)))
    in_specs = [
        pl.BlockSpec((tm, k), lambda i: (i, 0)),
        pl.BlockSpec((k, n), lambda i: (0, 0)),
        pl.BlockSpec((1, n), lambda i: (0, 0)),
    ]
    args = [x2d, w, bias.reshape(1, n)]
    if skip is not None:
        in_specs.append(pl.BlockSpec((tm, n), lambda i: (i, 0)))
        args.append(skip)
    out = pl.pallas_call(
        functools.partial(_mm_bias_kernel, act=act, has_skip=skip is not None),
        out_shape=jax.ShapeDtypeStruct((mp, n), out_dtype),
        grid=(mp // tm,),
        in_specs=in_specs,
        out_specs=pl.BlockSpec((tm, n), lambda i: (i, 0)),
        compiler_params=pltpu.CompilerParams(
            dimension_semantics=("parallel",),
            vmem_limit_bytes=_VMEM_LIMIT),
    )(*args)
    return out if mp == m else out[:m]


def _im2col(x_nhwc, kh, kw, stride, pad):
    n, h, w, c = x_nhwc.shape
    xp = jnp.pad(x_nhwc, ((0, 0), (pad, pad), (pad, pad), (0, 0)))
    ho = (h + 2 * pad - kh) // stride + 1
    wo = (w + 2 * pad - kw) // stride + 1
    cols = []
    for i in range(kh):
        for j in range(kw):
            cols.append(xp[:, i:i + stride * ho:stride, j:j + stride * wo:stride, :])
    patches = jnp.concatenate(cols, axis=-1)      # (N, Ho, Wo, 9*C), (i, j, c) order
    return patches.reshape(n * ho * wo, kh * kw * c), (n, ho, wo)


def conv3x3_bn_act(x_nhwc, w_taps, bias, *, stride, act):
    """3x3 conv (pad=1) + folded-BN shift + optional ReLU. w_taps: (9, C, Cout)."""
    n, h, wd, c = x_nhwc.shape
    cout = w_taps.shape[-1]
    if stride == 1:
        ho, wo = h, wd
        hp, wp = h + 2, wd + 2
        xp = jnp.pad(x_nhwc, ((0, 0), (1, 1), (1, 1), (0, 0)))
        out3 = pl.pallas_call(
            functools.partial(_conv3x3_kernel, ho=ho, wo=wo, act=act),
            out_shape=jax.ShapeDtypeStruct((n, ho * wo, cout), jnp.bfloat16),
            grid=(n,),
            in_specs=[
                pl.BlockSpec((1, hp, wp, c), lambda b: (b, 0, 0, 0)),
                pl.BlockSpec((9, c, cout), lambda b: (0, 0, 0)),
                pl.BlockSpec((1, cout), lambda b: (0, 0)),
            ],
            out_specs=pl.BlockSpec((1, ho * wo, cout), lambda b: (b, 0, 0)),
            compiler_params=pltpu.CompilerParams(
                dimension_semantics=("parallel",),
                vmem_limit_bytes=_VMEM_LIMIT),
        )(xp, w_taps, bias.reshape(1, cout))
        return out3.reshape(n, ho, wo, cout)
    # TODO(synk): express the strided (stride=2) 3x3 window gather in-kernel too;
    # for now the three small strided layers use host-side im2col + the fused matmul.
    x2d, (n2, ho, wo) = _im2col(x_nhwc, 3, 3, stride, 1)
    y2d = matmul_bias(x2d, w_taps.reshape(9 * c, cout), bias, act=act)
    return y2d.reshape(n2, ho, wo, cout)


def conv1x1_bn_act(x_nhwc, w, bias, *, stride=1, act, skip2d=None):
    """1x1 conv + folded-BN shift (+fused residual skip) (+ReLU)."""
    if stride > 1:
        x_nhwc = x_nhwc[:, ::stride, ::stride, :]
    n, h, wd, c = x_nhwc.shape
    cout = w.shape[1]
    y2d = matmul_bias(x_nhwc.reshape(n * h * wd, c), w, bias, act=act, skip=skip2d)
    return y2d.reshape(n, h, wd, cout)


# ----------------------------- parameter construction -----------------------------

def _kaiming(key, shape):  # (Cout, Cin, kh, kw), fan_out mode
    fan_out = shape[0] * shape[2] * shape[3]
    return jax.random.normal(key, shape, jnp.float32) * math.sqrt(2.0 / fan_out)


def _bn(key, c, eps=1e-5):
    k1, k2, k3, k4 = jax.random.split(key, 4)
    gamma = 1.0 + 0.1 * jax.random.normal(k1, (c,), jnp.float32)
    beta = 0.1 * jax.random.normal(k2, (c,), jnp.float32)
    mean = 0.1 * jax.random.normal(k3, (c,), jnp.float32)
    var = 1.0 + 0.1 * jnp.abs(jax.random.normal(k4, (c,), jnp.float32))
    scale = gamma / jnp.sqrt(var + eps)
    shift = beta - mean * scale
    return scale, shift


def _conv_bn_folded(key, cin, cout, ksize):
    """Conv2d(bias=False)+BatchNorm folded: returns bf16 matmul weight + f32 shift."""
    kw_, kb_ = jax.random.split(key)
    w = _kaiming(kw_, (cout, cin, ksize, ksize))
    scale, shift = _bn(kb_, cout)
    wt = jnp.transpose(w, (2, 3, 1, 0)) * scale          # (kh, kw, Cin, Cout) * scale[Cout]
    if ksize == 1:
        wm = wt.reshape(cin, cout)
    else:
        wm = wt.reshape(ksize * ksize, cin, cout)        # tap-major, matches kernel/im2col
    return wm.astype(jnp.bfloat16), shift.astype(jnp.float32)


def build_resnet_params(key, nblock, channels, strides, in_channels, num_classes,
                        base_width=64, groups=1):
    factor = 4
    keys = iter(jax.random.split(key, 4096))
    stem_w, stem_b = _conv_bn_folded(next(keys), in_channels, channels[0], 3)
    params = {"stem_w": stem_w, "stem_b": stem_b}
    in_ch = channels[0]
    layers = []
    for li in range(len(nblock)):
        ch, stride = channels[li], strides[li]
        has_ds = (in_ch != ch * factor) or (stride != 1)
        blocks = []
        for i in range(nblock[li]):
            if i == 1:  # mirror torch make_layer exactly
                stride = 1
                has_ds = False
                in_ch = ch * factor
            width = int(ch * (base_width / 64.0)) * groups
            w1, b1 = _conv_bn_folded(next(keys), in_ch, width, 1)
            w2, b2 = _conv_bn_folded(next(keys), width, width, 3)
            w3, b3 = _conv_bn_folded(next(keys), width, ch * factor, 1)
            blk = {"stride": stride, "w1": w1, "b1": b1, "w2": w2, "b2": b2,
                   "w3": w3, "b3": b3}
            if has_ds and i == 0:
                dsw, dsb = _conv_bn_folded(next(keys), in_ch, ch * factor, 1)
                blk["ds_w"] = dsw
                blk["ds_b"] = dsb
            blocks.append(blk)
        layers.append(blocks)
    params["layers"] = layers
    out_ch = channels[-1] * factor
    kf1, kf2 = jax.random.split(next(keys))
    params["fc_w"] = (jax.random.normal(kf1, (out_ch, num_classes), jnp.float32)
                      / math.sqrt(out_ch)).astype(jnp.bfloat16)
    params["fc_b"] = 0.1 * jax.random.normal(kf2, (num_classes,), jnp.float32)
    return params


# ----------------------------- forward pass -----------------------------

def bottleneck_forward(blk, x):
    # se=False, cbam=False, drop_path inactive (eval) -> identity paths.
    out = conv1x1_bn_act(x, blk["w1"], blk["b1"], act=True)
    out = conv3x3_bn_act(out, blk["w2"], blk["b2"], stride=blk["stride"], act=True)
    if "ds_w" in blk:
        skip = conv1x1_bn_act(x, blk["ds_w"], blk["ds_b"], stride=blk["stride"], act=False)
    else:
        skip = x
    n, h, w, c4 = skip.shape
    # relu(conv3+bn3 + skip) fused into the expand conv's matmul epilogue.
    return conv1x1_bn_act(out, blk["w3"], blk["b3"], act=True,
                          skip2d=skip.reshape(n * h * w, c4))


def resnet_forward(params, x_nchw):
    x = jnp.transpose(x_nchw, (0, 2, 3, 1)).astype(jnp.bfloat16)   # NCHW -> NHWC, bf16
    x = conv3x3_bn_act(x, params["stem_w"], params["stem_b"], stride=1, act=True)
    for blocks in params["layers"]:
        for blk in blocks:
            x = bottleneck_forward(blk, x)
    pooled = jnp.mean(x.astype(jnp.float32), axis=(1, 2))          # AdaptiveAvgPool + Flatten
    return matmul_bias(pooled.astype(jnp.bfloat16), params["fc_w"], params["fc_b"],
                       act=False, out_dtype=jnp.float32)


# ----------------------------- demo -----------------------------

if __name__ == "__main__":
    key = jax.random.PRNGKey(0)
    kp, kx = jax.random.split(key)

    nblock = [2, 2, 2, 2]
    channels = [8, 16, 32, 64]
    strides = [1, 2, 2, 2]
    in_channels = 3
    num_classes = 10
    batch, spatial = 2, 8

    params = build_resnet_params(kp, nblock, channels, strides, in_channels, num_classes)
    x = jax.random.normal(kx, (batch, in_channels, spatial, spatial), jnp.float32)

    logits = resnet_forward(params, x)
    jax.block_until_ready(logits)
    assert logits.shape == (batch, num_classes)
    print("KERNEL_OK")
</pallas_src>

<mosaic_0001>
module attributes {stable_mosaic.version = 11 : i64} {
  func.func @_conv3x3_kernel(%arg0: i32, %arg1: memref<1x10x10x3xbf16, #tpu.memory_space<vmem>>, %arg2: memref<9x3x8xbf16, #tpu.memory_space<vmem>>, %arg3: memref<1x8xf32, #tpu.memory_space<vmem>>, %arg4: memref<1x64x8xbf16, #tpu.memory_space<vmem>>) attributes {dimension_semantics = [#tpu.dimension_semantics<parallel>], iteration_bounds = array<i64: 2>, scalar_prefetch = 0 : i64, scratch_operands = 0 : i64, tpu.core_type = #tpu.core_type<tc>, window_params = [{transform_indices = @transform_0, window_bounds = array<i64: 1, 10, 10, 3>}, {pipeline_mode = #tpu.pipeline_mode<synchronous>, transform_indices = @transform_1, window_bounds = array<i64: 9, 3, 8>}, {pipeline_mode = #tpu.pipeline_mode<synchronous>, transform_indices = @transform_2, window_bounds = array<i64: 1, 8>}, {transform_indices = @transform_3, window_bounds = array<i64: 1, 64, 8>}]} {
    %c0 = arith.constant 0 : index
    %c0_0 = arith.constant 0 : index
    %c0_1 = arith.constant 0 : index
    %c0_2 = arith.constant 0 : index
    %0 = vector.load %arg1[%c0, %c0_0, %c0_1, %c0_2] : memref<1x10x10x3xbf16, #tpu.memory_space<vmem>>, vector<1x10x10x3xbf16>
    %c0_3 = arith.constant 0 : index
    %c0_4 = arith.constant 0 : index
    %c0_5 = arith.constant 0 : index
    %1 = vector.load %arg2[%c0_3, %c0_4, %c0_5] : memref<9x3x8xbf16, #tpu.memory_space<vmem>>, vector<9x3x8xbf16>
    %cst = arith.constant 0.000000e+00 : f32
    %2 = vector.broadcast %cst : f32 to vector<64x8xf32>
    %3 = vector.extract_strided_slice %0 {offsets = [0, 0, 0, 0], sizes = [1, 8, 8, 3], strides = [1, 1, 1, 1]} : vector<1x10x10x3xbf16> to vector<1x8x8x3xbf16>
    %4 = vector.shape_cast %3 : vector<1x8x8x3xbf16> to vector<8x8x3xbf16>
    %5 = vector.shape_cast %4 : vector<8x8x3xbf16> to vector<64x3xbf16>
    %6 = vector.extract_strided_slice %1 {offsets = [0, 0, 0], sizes = [1, 3, 8], strides = [1, 1, 1]} : vector<9x3x8xbf16> to vector<1x3x8xbf16>
    %7 = vector.shape_cast %6 : vector<1x3x8xbf16> to vector<3x8xbf16>
    %cst_6 = arith.constant dense<0.000000e+00> : vector<64x8xf32>
    %8 = tpu.matmul %5, %7, %cst_6 {dimension_numbers = #tpu.dot_dimension_numbers<[1], [0], [0], [1], [0, 0, 1, 1], [], []>} : vector<64x3xbf16>, vector<3x8xbf16>, vector<64x8xf32> -> vector<64x8xf32>
    %9 = arith.addf %2, %8 : vector<64x8xf32>
    %10 = vector.extract_strided_slice %0 {offsets = [0, 0, 1, 0], sizes = [1, 8, 8, 3], strides = [1, 1, 1, 1]} : vector<1x10x10x3xbf16> to vector<1x8x8x3xbf16>
    %11 = vector.shape_cast %10 : vector<1x8x8x3xbf16> to vector<8x8x3xbf16>
    %12 = vector.shape_cast %11 : vector<8x8x3xbf16> to vector<64x3xbf16>
    %13 = vector.extract_strided_slice %1 {offsets = [1, 0, 0], sizes = [1, 3, 8], strides = [1, 1, 1]} : vector<9x3x8xbf16> to vector<1x3x8xbf16>
    %14 = vector.shape_cast %13 : vector<1x3x8xbf16> to vector<3x8xbf16>
    %cst_7 = arith.constant dense<0.000000e+00> : vector<64x8xf32>
    %15 = tpu.matmul %12, %14, %cst_7 {dimension_numbers = #tpu.dot_dimension_numbers<[1], [0], [0], [1], [0, 0, 1, 1], [], []>} : vector<64x3xbf16>, vector<3x8xbf16>, vector<64x8xf32> -> vector<64x8xf32>
    %16 = arith.addf %9, %15 : vector<64x8xf32>
    %17 = vector.extract_strided_slice %0 {offsets = [0, 0, 2, 0], sizes = [1, 8, 8, 3], strides = [1, 1, 1, 1]} : vector<1x10x10x3xbf16> to vector<1x8x8x3xbf16>
    %18 = vector.shape_cast %17 : vector<1x8x8x3xbf16> to vector<8x8x3xbf16>
    %19 = vector.shape_cast %18 : vector<8x8x3xbf16> to vector<64x3xbf16>
    %20 = vector.extract_strided_slice %1 {offsets = [2, 0, 0], sizes = [1, 3, 8], strides = [1, 1, 1]} : vector<9x3x8xbf16> to vector<1x3x8xbf16>
    %21 = vector.shape_cast %20 : vector<1x3x8xbf16> to vector<3x8xbf16>
    %cst_8 = arith.constant dense<0.000000e+00> : vector<64x8xf32>
    %22 = tpu.matmul %19, %21, %cst_8 {dimension_numbers = #tpu.dot_dimension_numbers<[1], [0], [0], [1], [0, 0, 1, 1], [], []>} : vector<64x3xbf16>, vector<3x8xbf16>, vector<64x8xf32> -> vector<64x8xf32>
    %23 = arith.addf %16, %22 : vector<64x8xf32>
    %24 = vector.extract_strided_slice %0 {offsets = [0, 1, 0, 0], sizes = [1, 8, 8, 3], strides = [1, 1, 1, 1]} : vector<1x10x10x3xbf16> to vector<1x8x8x3xbf16>
    %25 = vector.shape_cast %24 : vector<1x8x8x3xbf16> to vector<8x8x3xbf16>
    %26 = vector.shape_cast %25 : vector<8x8x3xbf16> to vector<64x3xbf16>
    %27 = vector.extract_strided_slice %1 {offsets = [3, 0, 0], sizes = [1, 3, 8], strides = [1, 1, 1]} : vector<9x3x8xbf16> to vector<1x3x8xbf16>
    %28 = vector.shape_cast %27 : vector<1x3x8xbf16> to vector<3x8xbf16>
    %cst_9 = arith.constant dense<0.000000e+00> : vector<64x8xf32>
    %29 = tpu.matmul %26, %28, %cst_9 {dimension_numbers = #tpu.dot_dimension_numbers<[1], [0], [0], [1], [0, 0, 1, 1], [], []>} : vector<64x3xbf16>, vector<3x8xbf16>, vector<64x8xf32> -> vector<64x8xf32>
    %30 = arith.addf %23, %29 : vector<64x8xf32>
    %31 = vector.extract_strided_slice %0 {offsets = [0, 1, 1, 0], sizes = [1, 8, 8, 3], strides = [1, 1, 1, 1]} : vector<1x10x10x3xbf16> to vector<1x8x8x3xbf16>
    %32 = vector.shape_cast %31 : vector<1x8x8x3xbf16> to vector<8x8x3xbf16>
    %33 = vector.shape_cast %32 : vector<8x8x3xbf16> to vector<64x3xbf16>
    %34 = vector.extract_strided_slice %1 {offsets = [4, 0, 0], sizes = [1, 3, 8], strides = [1, 1, 1]} : vector<9x3x8xbf16> to vector<1x3x8xbf16>
    %35 = vector.shape_cast %34 : vector<1x3x8xbf16> to vector<3x8xbf16>
    %cst_10 = arith.constant dense<0.000000e+00> : vector<64x8xf32>
    %36 = tpu.matmul %33, %35, %cst_10 {dimension_numbers = #tpu.dot_dimension_numbers<[1], [0], [0], [1], [0, 0, 1, 1], [], []>} : vector<64x3xbf16>, vector<3x8xbf16>, vector<64x8xf32> -> vector<64x8xf32>
    %37 = arith.addf %30, %36 : vector<64x8xf32>
    %38 = vector.extract_strided_slice %0 {offsets = [0, 1, 2, 0], sizes = [1, 8, 8, 3], strides = [1, 1, 1, 1]} : vector<1x10x10x3xbf16> to vector<1x8x8x3xbf16>
    %39 = vector.shape_cast %38 : vector<1x8x8x3xbf16> to vector<8x8x3xbf16>
    %40 = vector.shape_cast %39 : vector<8x8x3xbf16> to vector<64x3xbf16>
    %41 = vector.extract_strided_slice %1 {offsets = [5, 0, 0], sizes = [1, 3, 8], strides = [1, 1, 1]} : vector<9x3x8xbf16> to vector<1x3x8xbf16>
    %42 = vector.shape_cast %41 : vector<1x3x8xbf16> to vector<3x8xbf16>
    %cst_11 = arith.constant dense<0.000000e+00> : vector<64x8xf32>
    %43 = tpu.matmul %40, %42, %cst_11 {dimension_numbers = #tpu.dot_dimension_numbers<[1], [0], [0], [1], [0, 0, 1, 1], [], []>} : vector<64x3xbf16>, vector<3x8xbf16>, vector<64x8xf32> -> vector<64x8xf32>
    %44 = arith.addf %37, %43 : vector<64x8xf32>
    %45 = vector.extract_strided_slice %0 {offsets = [0, 2, 0, 0], sizes = [1, 8, 8, 3], strides = [1, 1, 1, 1]} : vector<1x10x10x3xbf16> to vector<1x8x8x3xbf16>
    %46 = vector.shape_cast %45 : vector<1x8x8x3xbf16> to vector<8x8x3xbf16>
    %47 = vector.shape_cast %46 : vector<8x8x3xbf16> to vector<64x3xbf16>
    %48 = vector.extract_strided_slice %1 {offsets = [6, 0, 0], sizes = [1, 3, 8], strides = [1, 1, 1]} : vector<9x3x8xbf16> to vector<1x3x8xbf16>
    %49 = vector.shape_cast %48 : vector<1x3x8xbf16> to vector<3x8xbf16>
    %cst_12 = arith.constant dense<0.000000e+00> : vector<64x8xf32>
    %50 = tpu.matmul %47, %49, %cst_12 {dimension_numbers = #tpu.dot_dimension_numbers<[1], [0], [0], [1], [0, 0, 1, 1], [], []>} : vector<64x3xbf16>, vector<3x8xbf16>, vector<64x8xf32> -> vector<64x8xf32>
    %51 = arith.addf %44, %50 : vector<64x8xf32>
    %52 = vector.extract_strided_slice %0 {offsets = [0, 2, 1, 0], sizes = [1, 8, 8, 3], strides = [1, 1, 1, 1]} : vector<1x10x10x3xbf16> to vector<1x8x8x3xbf16>
    %53 = vector.shape_cast %52 : vector<1x8x8x3xbf16> to vector<8x8x3xbf16>
    %54 = vector.shape_cast %53 : vector<8x8x3xbf16> to vector<64x3xbf16>
    %55 = vector.extract_strided_slice %1 {offsets = [7, 0, 0], sizes = [1, 3, 8], strides = [1, 1, 1]} : vector<9x3x8xbf16> to vector<1x3x8xbf16>
    %56 = vector.shape_cast %55 : vector<1x3x8xbf16> to vector<3x8xbf16>
    %cst_13 = arith.constant dense<0.000000e+00> : vector<64x8xf32>
    %57 = tpu.matmul %54, %56, %cst_13 {dimension_numbers = #tpu.dot_dimension_numbers<[1], [0], [0], [1], [0, 0, 1, 1], [], []>} : vector<64x3xbf16>, vector<3x8xbf16>, vector<64x8xf32> -> vector<64x8xf32>
    %58 = arith.addf %51, %57 : vector<64x8xf32>
    %59 = vector.extract_strided_slice %0 {offsets = [0, 2, 2, 0], sizes = [1, 8, 8, 3], strides = [1, 1, 1, 1]} : vector<1x10x10x3xbf16> to vector<1x8x8x3xbf16>
    %60 = vector.shape_cast %59 : vector<1x8x8x3xbf16> to vector<8x8x3xbf16>
    %61 = vector.shape_cast %60 : vector<8x8x3xbf16> to vector<64x3xbf16>
    %62 = vector.extract_strided_slice %1 {offsets = [8, 0, 0], sizes = [1, 3, 8], strides = [1, 1, 1]} : vector<9x3x8xbf16> to vector<1x3x8xbf16>
    %63 = vector.shape_cast %62 : vector<1x3x8xbf16> to vector<3x8xbf16>
    %cst_14 = arith.constant dense<0.000000e+00> : vector<64x8xf32>
    %64 = tpu.matmul %61, %63, %cst_14 {dimension_numbers = #tpu.dot_dimension_numbers<[1], [0], [0], [1], [0, 0, 1, 1], [], []>} : vector<64x3xbf16>, vector<3x8xbf16>, vector<64x8xf32> -> vector<64x8xf32>
    %65 = arith.addf %58, %64 : vector<64x8xf32>
    %c0_15 = arith.constant 0 : index
    %c0_16 = arith.constant 0 : index
    %66 = vector.load %arg3[%c0_15, %c0_16] : memref<1x8xf32, #tpu.memory_space<vmem>>, vector<1x8xf32>
    %67 = vector.broadcast %66 : vector<1x8xf32> to vector<64x8xf32>
    %68 = arith.addf %65, %67 : vector<64x8xf32>
    %cst_17 = arith.constant 0.000000e+00 : f32
    %69 = vector.broadcast %cst_17 : f32 to vector<64x8xf32>
    %70 = arith.maximumf %68, %69 : vector<64x8xf32>
    %71 = vector.shape_cast %70 : vector<64x8xf32> to vector<1x64x8xf32>
    %72 = arith.truncf %71 : vector<1x64x8xf32> to vector<1x64x8xbf16>
    %c0_18 = arith.constant 0 : index
    %c0_19 = arith.constant 0 : index
    %c0_20 = arith.constant 0 : index
    %73 = vector.load %arg4[%c0_18, %c0_19, %c0_20] : memref<1x64x8xbf16, #tpu.memory_space<vmem>>, vector<1x64x8xbf16>
    tpu.vector_store %arg4[%c0_18, %c0_19, %c0_20], %72 {strides = array<i32>} : memref<1x64x8xbf16, #tpu.memory_space<vmem>>, vector<1x64x8xbf16>,
    return
  }
  func.func @transform_0(%arg0: i32) -> (i32, i32, i32, i32) {
    %c0_i32 = arith.constant 0 : i32
    %c0_i32_0 = arith.constant 0 : i32
    %c0_i32_1 = arith.constant 0 : i32
    %c0_i32_2 = arith.constant 0 : i32
    return %arg0, %c0_i32, %c0_i32_0, %c0_i32_1 : i32, i32, i32, i32
  }
  func.func @transform_1(%arg0: i32) -> (i32, i32, i32) {
    %c0_i32 = arith.constant 0 : i32
    %c0_i32_0 = arith.constant 0 : i32
    %c0_i32_1 = arith.constant 0 : i32
    %c0_i32_2 = arith.constant 0 : i32
    return %c0_i32, %c0_i32_0, %c0_i32_1 : i32, i32, i32
  }
  func.func @transform_2(%arg0: i32) -> (i32, i32) {
    %c0_i32 = arith.constant 0 : i32
    %c0_i32_0 = arith.constant 0 : i32
    %c0_i32_1 = arith.constant 0 : i32
    return %c0_i32, %c0_i32_0 : i32, i32
  }
  func.func @transform_3(%arg0: i32) -> (i32, i32, i32) {
    %c0_i32 = arith.constant 0 : i32
    %c0_i32_0 = arith.constant 0 : i32
    %c0_i32_1 = arith.constant 0 : i32
    return %arg0, %c0_i32, %c0_i32_0 : i32, i32, i32
  }
}

</mosaic_0001>

<bundles_post_ra>
// kernel: tpu_custom_call.1
= control target key start
LH: loop header
LB: loop body
LE: loop exit
PB: predicated region body
PF: predicated region fallthrough
CT: control target
= control target key end

     0   :  { %s1086_s12 = smov 0   ;;  %s1485_s0 = inlined_call_operand.vmem [shape: bf16[2,10,10,3], index: 0, kind: input, shape index: {}]   ;;  %s1486_s1 = inlined_call_operand.vmem [shape: bf16[9,3,8], index: 1, kind: input, shape index: {}]   ;;  %s1487_s2 = inlined_call_operand.vmem [shape: f32[1,8], index: 2, kind: input, shape index: {}]   ;;  %s1488_s3 = inlined_call_operand.vmem [shape: bf16[2,64,8], index: 3, kind: output, shape index: {}]  }
   0x1 LB: > { %s986_s13 = sadd.s32 4294967295, %s1063_s12   ;;  %p990_p0 = scmp.ge.s32.totalorder %s1063_s12, 1  ;;  %s1063_s12 = sphi %s1086_s12, %s13_s12  }
   0x2   : > { %p137_p1 = scmp.lt.s32.totalorder %s1063_s12, 3 }
   0x4   : > { %p138_p2 = pnand %p990_p0, %p137_p1 }
   0x5   : > { %p161_p3 = scmp.lt.s32.totalorder (!%p138_p2), %s986_s13, 1 }
   0x6   : > { %141 = sbr.rel (%p138_p2) target bundleno = 320 (0x140), region = 32 }
   0xb   : > { %v193_v0 = vld [vmem:[%s1486_s1 + $0x2] sm:$0x3]  ;;  %vm341_vm0 = vcmask 1040384   ;;  %vm342_vm1 = vcmask 1041408   ;;  %v1065_v1 = vmov 65535   ;;  %s1494_s13 = smov (!%p161_p3, %s986_s13), 1 }
   0xc   : > { %v343_v2 = vsel %vm341_vm0, 4294967295, %v1065_v1  ;;  %v194_v4 = vld [vmem:[%s1486_s1 + $0x4] sm:$0x3]  ;;  %s1046_s18 = smul.u32 80, %s1494_s13  ;;  %v195_v7 = vld [vmem:[%s1486_s1 + $0x6] sm:$0x3] }
   0xd   : > { %v1097_v3 = vsel %vm342_vm1, %v343_v2, 0  ;;  %v192_v8 = vld [vmem:[%s1486_s1] sm:$0x3]  ;;  %v196_v11 = vld [vmem:[%s1486_s1 + $0x8] sm:$0x3]  ;;  %vm328_vm4 = vcmask 23552  }
   0xe   : > { %v346_v5 = vand.u32 %v1097_v3, %v193_v0  ;;  %v509_v6 = vand.u32 %v1097_v3, %v194_v4  ;;  %v567_v9 = vand.u32 %v1097_v3, %v195_v7  ;;  %v410_v10 = vand.u32 %v1097_v3, %v192_v8  ;;  %s1121_s27 = scalar_lea.vmem %s1485_s0, %s1046_s18  ;;  %s1042_s11 = sshll.u32 %s1494_s13, 5 }
   0xf   : > { %vm201_vm2 = vsmask.f32 3328  ;;  %vm202_vm3 = vsmask.f32 7440  ;;  %v638_v12 = vand.u32 %v1097_v3, %v196_v11  ;;  %v1125_v13 = vld [vmem:[%s1121_s27 + $0x10] sm:$0xf]  ;;  %s1436_s16 = scalar_lea.vmem %s1488_s3, %s1042_s11 }
  0x10   : > { %1043 = vmatpush.bf16.msra.mxu1 %v346_v5  ;;  %1044 = vmatpush.bf16.msra.mxu2 %v346_v5  ;;  %v1128_v14 = vld [vmem:[%s1121_s27 + $0x14] sm:$0x1]  ;;  %v1131_v15 = vld [vmem:[%s1121_s27 + $0x18] sm:$0xf]  ;;  %v1134_v16 = vld [vmem:[%s1121_s27 + $0x1c] sm:$0x1] }
  0x11   : > { %1045 = vmatpush.bf16.msra.mxu3 %v346_v5  ;;  %355 = vmatpush.bf16.msra.mxu0 %v346_v5  ;;  %v233_v17 = vshrl.u32 %v1125_v13, 16  ;;  %v236_v18 = vshll.u32 %v1125_v13, 16  ;;  %v242_v19 = vshll.u32 %v1128_v14, 16  ;;  %v247_v20 = vshrl.u32 %v1131_v15, 16  ;;  %v1143_v23 = vld [vmem:[%s1121_s27 + $0x20] sm:$0xf]  ;;  %vm1164_vm5 = vmor %vm201_vm2, %vm202_vm3 }
  0x12   : > { %v250_v21 = vshll.u32 %v1131_v15, 16  ;;  %v256_v22 = vshll.u32 %v1134_v16, 16  ;;  %v1146_v24 = vld [vmem:[%s1121_s27 + $0x24] sm:$0x1]  ;;  %v1149_v29 = vld [vmem:[%s1121_s27 + $0x28] sm:$0xf] }
  0x13   : > { %v235_v25 = vrot.slane %v233_v17, 4  ;;  %v238_v26 = vrot.slane %v236_v18, 5  ;;  %v244_v27 = vrot.slane %v242_v19, 5  ;;  %v249_v28 = vrot.slane %v247_v20, 4  ;;  %v1152_v32 = vld [vmem:[%s1121_s27 + $0x2c] sm:$0x1] }
  0x14   : > { %518 = vmatpush.bf16.msrb.mxu2 %v509_v6  ;;  %419 = vmatpush.bf16.msrb.mxu1 %v410_v10  ;;  %v252_v30 = vrot.slane %v250_v21, 5  ;;  %v258_v31 = vrot.slane %v256_v22, 5  ;;  %v261_v33 = vshrl.u32 %v1143_v23, 16  ;;  %v264_v34 = vshll.u32 %v1143_v23, 16  ;;  %v1160_v39 = vld [vmem:[%s1121_s27 + $0x30] sm:$0xf] }
  0x15   : > { %576 = vmatpush.bf16.msrb.mxu3 %v567_v9  ;;  %647 = vmatpush.bf16.msrb.mxu0 %v638_v12  ;;  %v239_v35 = vor.u32 %v238_v26, %v235_v25  ;;  %v270_v36 = vshll.u32 %v1146_v24, 16  ;;  %v275_v37 = vshrl.u32 %v1149_v29, 16  ;;  %v278_v38 = vshll.u32 %v1149_v29, 16  ;;  %v1170_v45 = vld [vmem:[%s1121_s27 + $0x34] sm:$0x1] }
  0x16   : > { %v253_v41 = vor.u32 %v252_v30, %v249_v28  ;;  %v263_v42 = vrot.slane %v261_v33, 4  ;;  %v266_v43 = vrot.slane %v264_v34, 5  ;;  %v284_v44 = vshll.u32 %v1152_v32, 16  ;;  %v1176_v56 = vld [vmem:[%s1121_s27 + $0x38] sm:$0xf] }
  0x17   : > { %v240_v46 = vrot.slane %v239_v35, 4  ;;  %v272_v47 = vrot.slane %v270_v36, 5  ;;  %v277_v48 = vrot.slane %v275_v37, 4  ;;  %v280_v49 = vrot.slane %v278_v38, 5  ;;  %v1179_v57 = vld [vmem:[%s1121_s27 + $0x3c] sm:$0x1] }
  0x18   : > { %v254_v50 = vrot.slane %v253_v41, 4  ;;  %v267_v51 = vor.u32 %v266_v43, %v263_v42  ;;  %v286_v52 = vrot.slane %v284_v44, 5  ;;  %v289_v53 = vshrl.u32 %v1160_v39, 16  ;;  %v1190_v5 = vld [vmem:[%s1121_s27] sm:$0xf] }
  0x19   : > { %v245_v54 = vsel %vm1164_vm5, %v240_v46, %v244_v27  ;;  %v281_v55 = vor.u32 %v280_v49, %v277_v48  ;;  %v292_v58 = vshll.u32 %v1160_v39, 16  ;;  %v298_v59 = vshll.u32 %v1170_v45, 16  ;;  %v173_v10 = vld [vmem:[%s1121_s27 + $0x4] sm:$0x1]  ;;  %v1207_v19 = vld [vmem:[%s1121_s27 + $0x8] sm:$0xf] }
  0x1a   : > { %vm449_vm6 = vcmask 1042432   ;;  %v259_v60 = vsel %vm1164_vm5, %v254_v50, %v258_v31  ;;  %v1185_v61 = vunpack.c.l.b16 %v245_v54  ;;  %v268_v62 = vrot.slane %v267_v51, 4  ;;  %v175_v34 = vld [vmem:[%s1121_s27 + $0xc] sm:$0x1] }
  0x1b   : > { %v291_v63 = vrot.slane %v289_v53, 4  ;;  %v1187_v0 = vunpack.c.l.b16 %v259_v60  ;;  %v282_v1 = vrot.slane %v281_v55, 4  ;;  %v294_v2 = vrot.slane %v292_v58, 5  ;;  %v198_v55 = vld [vmem:[%s1486_s1 + $0xc] sm:$0x3] }
  0x1c   : > { %v300_v4 = vrot.slane %v298_v59, 5  ;;  %v273_v6 = vsel %vm1164_vm5, %v268_v62, %v272_v47  ;;  %v303_v7 = vshrl.u32 %v1176_v56, 16  ;;  %v306_v8 = vshll.u32 %v1176_v56, 16 }
  0x1d   : > { %v312_v9 = vshll.u32 %v1179_v57, 16  ;;  %v1200_v11 = vpack.c.b16 %v1187_v0, %v1185_v61  ;;  %v287_v12 = vsel %vm1164_vm5, %v282_v1, %v286_v52  ;;  %v1204_v17 = vunpack.c.l.b16 %v273_v6  ;;  %v199_v6 = vld [vmem:[%s1486_s1 + $0xe] sm:$0x3] }
  0x1e   : > { %v295_v18 = vor.u32 %v294_v2, %v291_v63  ;;  %v1209_v20 = vunpack.c.l.b16 %v287_v12  ;;  %v305_v21 = vrot.slane %v303_v7, 4  ;;  %v308_v22 = vrot.slane %v306_v8, 5  ;;  %v197_v7 = vld [vmem:[%s1486_s1 + $0xa] sm:$0x3]  ;;  %v200_v12 = vld [vmem:[%s1486_s1 + $0x10] sm:$0x3] }
  0x1f   : > { %v314_v25 = vrot.slane %v312_v9, 5  ;;  %995 = vmatmul.msk.bf16.vlgmr.msra.gmra.mxu1 %vm328_vm4, %v1200_v11  ;;  %v205_v27 = vshrl.u32 %v1190_v5, 16  ;;  %v208_v28 = vshll.u32 %v1190_v5, 16  ;;  %v214_v30 = vshll.u32 %v173_v10, 16 }
  0x20   : > { %v296_v26 = vrot.slane %v295_v18, 4  ;;  %v1217_v31 = vpack.c.b16 %v1209_v20, %v1204_v17  ;;  %v309_v33 = vor.u32 %v308_v22, %v305_v21  ;;  %v219_v35 = vshrl.u32 %v1207_v19, 16 }
  0x21   : > { %v222_v36 = vshll.u32 %v1207_v19, 16  ;;  %v207_v38 = vrot.slane %v205_v27, 4  ;;  %v210_v41 = vrot.slane %v208_v28, 5  ;;  %vm450_vm7 = vcmask 1046532  }
  0x22   : > { %v301_v37 = vsel %vm1164_vm5, %v296_v26, %v300_v4  ;;  %996 = vmatmul.msk.bf16.vlgmr.msra.gmra.mxu2 %vm328_vm4, %v1217_v31  ;;  %v310_v42 = vrot.slane %v309_v33, 4  ;;  %v216_v43 = vrot.slane %v214_v30, 5  ;;  %v221_v44 = vrot.slane %v219_v35, 4  ;;  %vm1231_vm8 = vmor %vm449_vm6, %vm450_vm7 }
  0x23   : > { %v224_v46 = vrot.slane %v222_v36, 5  ;;  %v1226_v47 = vunpack.c.l.b16 %v301_v37  ;;  %v211_v48 = vor.u32 %v210_v41, %v207_v38  ;;  %v228_v49 = vshll.u32 %v175_v34, 16 }
  0x24   : > { %v454_v50 = vrot.slane %v173_v10, 5  ;;  %v315_v51 = vsel %vm1164_vm5, %v310_v42, %v314_v25  ;;  %v458_v53 = vrot.slane %v175_v34, 5  ;;  %v1002_v62 = vrot.slane %v1190_v5, 9 }
  0x25   : > { %v225_v52 = vor.u32 %v224_v46, %v221_v44  ;;  %v1238_v58 = vunpack.c.l.b16 %v315_v51  ;;  %v212_v59 = vrot.slane %v211_v48, 4  ;;  %v230_v60 = vrot.slane %v228_v49, 5 }
  0x26   : > { %v385_v1 = vunpack.c.l.b16 %v1190_v5  ;;  %v386_v2 = vunpack.c.l.b16 %v1207_v19  ;;  %v1003_v4 = vrot.slane %v1207_v19, 9  ;;  %v455_v5 = vsel %vm1231_vm8, %v1002_v62, %v454_v50 }
  0x27   : > { %v226_v63 = vrot.slane %v225_v52, 4  ;;  %v1252_v8 = vpack.c.b16 %v1238_v58, %v1226_v47  ;;  %v217_v9 = vsel %vm1164_vm5, %v212_v59, %v216_v43  ;;  %v746_v10 = vand.u32 %v1097_v3, %v198_v55 }
  0x28   : > { %v316_v19 = vunpack.c.l.b16 %v217_v9  ;;  %v1266_v21 = vsel %vm1231_vm8, %v1003_v4, %v458_v53  ;;  %v805_v25 = vand.u32 %v1097_v3, %v199_v6  ;;  %v700_v26 = vand.u32 %v1097_v3, %v197_v7 }
  0x29   : > { %v231_v18 = vsel %vm1164_vm5, %v226_v63, %v230_v60  ;;  %997 = vmatmul.msk.bf16.vlgmr.msra.gmra.mxu3 %vm328_vm4, %v1252_v8  ;;  %755 = vmatpush.bf16.msra.mxu2 %v746_v10  ;;  %v484_v27 = vunpack.c.l.b16 %v455_v5  ;;  %v485_v28 = vunpack.c.l.b16 %v1266_v21  ;;  %v855_v30 = vand.u32 %v1097_v3, %v200_v12  ;;  %v190_v21 = vld [vmem:[%s1121_s27 + $0x48] sm:$0xf] }
  0x2a   : > { %v317_v22 = vunpack.c.l.b16 %v231_v18  ;;  %v393_v34 = vpack.c.b16 %v386_v2, %v385_v1  ;;  %814 = vmatpush.bf16.msra.mxu3 %v805_v25  ;;  %709 = vmatpush.bf16.msra.mxu1 %v700_v26  ;;  %v387_v36 = vunpack.c.l.b16 %v1125_v13  ;;  %v1004_v37 = vrot.slane %v1125_v13, 9 }
  0x2b   : > { %v492_v35 = vpack.c.b16 %v485_v28, %v484_v27  ;;  %v462_v3 = vrot.slane %v1128_v14, 5  ;;  %v1005_v38 = vrot.slane %v1131_v15, 9  ;;  %v466_v41 = vrot.slane %v1134_v16, 5 }
  0x2c   : > { %v324_v33 = vpack.c.b16 %v317_v22, %v316_v19  ;;  %v550_v42 = vpack.c.b16 %v387_v36, %v386_v2  ;;  %v388_v43 = vunpack.c.l.b16 %v1131_v15  ;;  %v621_v13 = vpack.c.b16 %v1185_v61, %v317_v22  ;;  %v189_v22 = vld [vmem:[%s1121_s27 + $0x44] sm:$0x1] }
  0x2d   : > { %v1287_v44 = vsel %vm1231_vm8, %v1004_v37, %v462_v3  ;;  %v1291_v46 = vsel %vm1231_vm8, %v1005_v38, %v466_v41  ;;  %v389_v49 = vunpack.c.l.b16 %v1143_v23  ;;  %v1006_v50 = vrot.slane %v1143_v23, 9 }
  0x2e   : > { %994 = vmatmul.msk.bf16.vlgmr.msra.gmra.mxu0 %vm328_vm4, %v324_v33  ;;  %v486_v14 = vunpack.c.l.b16 %v1287_v44  ;;  %v487_v48 = vunpack.c.l.b16 %v1291_v46  ;;  %v394_v16 = vpack.c.b16 %v388_v43, %v387_v36  ;;  %v470_v61 = vrot.slane %v1146_v24, 5  ;;  %v191_v44 = vld [vmem:[%s1121_s27 + $0x4c] sm:$0x1] }
  0x2f   : > { %864 = vmatpush.bf16.msra.mxu0 %v855_v30  ;;  %998 = vmatmul.msk.bf16.vlgmr.msrb.gmra.mxu1 %vm328_vm4, %v393_v34  ;;  %v1007_v51 = vrot.slane %v1149_v29, 9  ;;  %v474_v52 = vrot.slane %v1152_v32, 5  ;;  %v551_v53 = vpack.c.b16 %v389_v49, %v388_v43  ;;  %v390_v55 = vunpack.c.l.b16 %v1149_v29  ;;  %v1318_v29 = vld [vmem:[%s1121_s27 + $0x40] sm:$0xf] }
  0x30   : > { %v493_v15 = vpack.c.b16 %v487_v48, %v486_v14  ;;  %v471_v59 = vsel %vm1231_vm8, %v1006_v50, %v470_v61  ;;  %v622_v23 = vpack.c.b16 %v1204_v17, %v1187_v0  ;;  %v391_v1 = vunpack.c.l.b16 %v1160_v39 }
  0x31   : > { %v475_v60 = vsel %vm1231_vm8, %v1007_v51, %v474_v52  ;;  %v488_v62 = vunpack.c.l.b16 %v471_v59  ;;  %v395_v63 = vpack.c.b16 %v390_v55, %v389_v49  ;;  %v607_v2 = vshrl.u32 %v1318_v29, 16 }
  0x32   : > { %1010 = vmatmul.msk.bf16.vlgmr.msrb.gmra.mxu2 %vm328_vm4, %v492_v35  ;;  %v489_v24 = vunpack.c.l.b16 %v475_v60  ;;  %v610_v4 = vshll.u32 %v1318_v29, 16  ;;  %v1008_v0 = vrot.slane %v1160_v39, 9  ;;  %v478_v17 = vrot.slane %v1170_v45, 5 }
  0x33   : > { %v1009_v6 = vrot.slane %v1176_v56, 9  ;;  %v482_v7 = vrot.slane %v1179_v57, 5  ;;  %v552_v9 = vpack.c.b16 %v391_v1, %v390_v55  ;;  %v609_v5 = vrot.slane %v607_v2, 4 }
  0x34   : > { %v494_v32 = vpack.c.b16 %v489_v24, %v488_v62  ;;  %v612_v10 = vrot.slane %v610_v4, 5  ;;  %v392_v12 = vunpack.c.l.b16 %v1176_v56  ;;  %v479_v18 = vsel %vm1231_vm8, %v1008_v0, %v478_v17 }
  0x35   : > { %v483_v19 = vsel %vm1231_vm8, %v1009_v6, %v482_v7  ;;  %v623_v39 = vpack.c.b16 %v1226_v47, %v1209_v20  ;;  %v490_v45 = vunpack.c.l.b16 %v479_v18  ;;  %v616_v26 = vshll.u32 %v189_v22, 16 }
  0x36   : > { %v491_v25 = vunpack.c.l.b16 %v483_v19  ;;  %v613_v57 = vor.u32 %v612_v10, %v609_v5  ;;  %v396_v27 = vpack.c.b16 %v392_v12, %v391_v1  ;;  %v549_v34 = vunpack.c.l.b16 %v1318_v29 }
  0x37   : > { %v618_v33 = vrot.slane %v616_v26, 5  ;;  %v683_v37 = vpack.c.b16 %v486_v14, %v485_v28  ;;  %v684_v3 = vpack.c.b16 %v488_v62, %v487_v48  ;;  %v786_v28 = vshrl.u32 %v190_v21, 16 }
  0x38   : > { %v495_v56 = vpack.c.b16 %v491_v25, %v490_v45  ;;  %v614_v30 = vrot.slane %v613_v57, 4  ;;  %v553_v20 = vpack.c.b16 %v549_v34, %v392_v12  ;;  %v789_v38 = vshll.u32 %v190_v21, 16 }
  0x39   : > { %1014 = vmatmul.msk.bf16.vlgmr.msrb.gmra.mxu3 %vm328_vm4, %v550_v42  ;;  %v680_v41 = vrot.slane %v189_v22, 5  ;;  %v788_v42 = vrot.slane %v786_v28, 4  ;;  %v740_v48 = vunpack.c.l.b16 %v190_v21  ;;  %v1035_v52 = vrot.slane %v190_v21, 9 }
  0x3a   : > { %v619_v35 = vsel %vm1164_vm5, %v614_v30, %v618_v33  ;;  %v791_v43 = vrot.slane %v789_v38, 5  ;;  %vm922_vm9 = vcmask 60416  }
  0x3b   : > { %v620_v47 = vunpack.c.l.b16 %v619_v35  ;;  %v741_v61 = vpack.c.b16 %v740_v48, %v549_v34 }
  0x3d   : > { %v624_v36 = vpack.c.b16 %v620_v47, %v1238_v58  ;;  %v685_v58 = vpack.c.b16 %v490_v45, %v489_v24 }
  0x3e   : > { %1018 = vmatmul.msk.bf16.vlgmr.msrb.gmra.mxu0 %vm328_vm4, %v621_v13  ;;  %v795_v13 = vshll.u32 %v191_v44, 16 }
  0x3f   : > { %999 = vmatmul.msk.bf16.gmra.mxu1 %vm328_vm4, %v394_v16 }
  0x42   : > { %1011 = vmatmul.msk.bf16.gmra.mxu2 %vm328_vm4, %v493_v15 }
  0x49   : > { %1015 = vmatmul.msk.bf16.gmra.mxu3 %vm328_vm4, %v551_v53  ;;  %v847_v53 = vrot.slane %v191_v44, 5 }
  0x4e   : > { %1019 = vmatmul.msk.bf16.gmra.mxu0 %vm328_vm4, %v622_v23 }
  0x4f   : > { %1000 = vmatmul.msk.bf16.gmra.mxu1 %vm328_vm4, %v395_v63 }
  0x52   : > { %1012 = vmatmul.msk.bf16.gmra.mxu2 %vm328_vm4, %v494_v32 }
  0x59   : > { %1016 = vmatmul.msk.bf16.gmra.mxu3 %vm328_vm4, %v552_v9 }
  0x5e   : > { %1020 = vmatmul.msk.bf16.gmra.mxu0 %vm328_vm4, %v623_v39 }
  0x5f   : > { %1001 = vmatmul.msk.bf16.gmra.mxu1 %vm328_vm4, %v396_v27 }
  0x62   : > { %1013 = vmatmul.msk.bf16.gmra.mxu2 %vm328_vm4, %v495_v56 }
  0x69   : > { %1017 = vmatmul.msk.bf16.gmra.mxu3 %vm328_vm4, %v553_v20 }
  0x6e   : > { %1021 = vmatmul.msk.bf16.gmra.mxu0 %vm328_vm4, %v624_v36 }
  0x6f   : > { %1023 = vmatmul.msk.bf16.vlgmr.msra.gmra.mxu1 %vm328_vm4, %v683_v37 }
  0x72   : > { %1027 = vmatmul.msk.bf16.vlgmr.msra.gmra.mxu2 %vm328_vm4, %v394_v16 }
  0x79   : > { %1031 = vmatmul.msk.bf16.vlgmr.msra.gmra.mxu3 %vm328_vm4, %v1200_v11  ;;  %v1022_v11 = vrot.slane %v1318_v29, 9 }
  0x7b   : > { %v681_v46 = vsel %vm1231_vm8, %v1022_v11, %v680_v41 }
  0x7c   : > { %v682_v14 = vunpack.c.l.b16 %v681_v46 }
  0x7e   : > { %1036 = vmatmul.msk.bf16.vlgmr.msra.gmra.mxu0 %vm328_vm4, %v493_v15  ;;  %v797_v15 = vrot.slane %v795_v13, 5  ;;  %v686_v49 = vpack.c.b16 %v682_v14, %v491_v25 }
  0x7f   : > { %1024 = vmatmul.msk.bf16.gmra.mxu1 %vm328_vm4, %v684_v3 }
  0x82   : > { %1028 = vmatmul.msk.bf16.gmra.mxu2 %vm328_vm4, %v395_v63 }
  0x89   : > { %1032 = vmatmul.msk.bf16.gmra.mxu3 %vm328_vm4, %v1217_v31  ;;  %v792_v31 = vor.u32 %v791_v43, %v788_v42 }
  0x8b   : > { %v793_v16 = vrot.slane %v792_v31, 4 }
  0x8d   : > { %v798_v51 = vsel %vm1164_vm5, %v793_v16, %v797_v15 }
  0x8e   : > { %1037 = vmatmul.msk.bf16.gmra.mxu0 %vm328_vm4, %v494_v32  ;;  %v799_v55 = vunpack.c.l.b16 %v798_v51 }
  0x8f   : > { %1025 = vmatmul.msk.bf16.gmra.mxu1 %vm328_vm4, %v685_v58 }
  0x90   : > { %v800_v60 = vpack.c.b16 %v799_v55, %v620_v47 }
  0x92   : > { %1029 = vmatmul.msk.bf16.gmra.mxu2 %vm328_vm4, %v396_v27 }
  0x99   : > { %1033 = vmatmul.msk.bf16.gmra.mxu3 %vm328_vm4, %v1252_v8  ;;  %v848_v8 = vsel %vm1231_vm8, %v1035_v52, %v847_v53  ;;  %v1428_v53 = vld [vmem:[%s1487_s2] ss:$0 sm:$0xff] }
  0x9a   : > { %v849_v23 = vunpack.c.l.b16 %v848_v8 }
  0x9c   : > { %v1369_v50 = vpop.f32.mrf.mxu1  ;;  %v850_v40 = vpack.c.b16 %v849_v23, %v682_v14 }
  0x9e   : > { %1038 = vmatmul.msk.bf16.gmra.mxu0 %vm328_vm4, %v495_v56 }
  0x9f   : > { %1026 = vmatmul.msk.bf16.gmra.mxu1 %vm328_vm4, %v686_v49 }
  0xa2   : > { %1030 = vmatmul.msk.bf16.gmra.mxu2 %vm328_vm4, %v741_v61 }
  0xa4   : > { %v1378_v59 = vpop.f32.mrf.mxu1 }
  0xa5   : > { %v1380_v62 = vpop.f32.mrf.mxu2 }
  0xa9   : > { %1034 = vmatmul.msk.bf16.gmra.mxu3 %vm328_vm4, %v800_v60 }
  0xab   : > { %v357_v24 = vpop.f32.mrf.mxu0 }
  0xac   : > { %v1383_v63 = vpop.f32.mrf.mxu3  ;;  %v421_v32 = vpop.f32.mrf.mxu1 }
  0xad   : > { %v1386_v29 = vpop.f32.mrf.mxu2  ;;  %v422_v37 = vadd.f32 %v421_v32, %v357_v24 }
  0xae   : > { %1039 = vmatmul.msk.bf16.gmra.mxu0 %vm328_vm4, %v850_v40 }
  0xb3   : > { %v359_v1 = vpop.f32.mrf.mxu0 }
  0xb4   : > { %v1388_v54 = vpop.f32.mrf.mxu3  ;;  %v423_v2 = vpop.f32.mrf.mxu1 }
  0xb5   : > { %v520_v4 = vpop.f32.mrf.mxu2  ;;  %v424_v41 = vadd.f32 %v423_v2, %v359_v1 }
  0xb6   : > { %v540_v21 = vadd.f32 %v520_v4, %v422_v37 }
  0xbb   : > { %v649_v0 = vpop.f32.mrf.mxu0 }
  0xbc   : > { %v578_v17 = vpop.f32.mrf.mxu3  ;;  %v426_v6 = vpop.f32.mrf.mxu1 }
  0xbd   : > { %v522_v7 = vpop.f32.mrf.mxu2  ;;  %v598_v38 = vadd.f32 %v578_v17, %v540_v21  ;;  %v427_v15 = vadd.f32 %v426_v6, %v1369_v50 }
  0xbe   : > { %v541_v44 = vadd.f32 %v522_v7, %v424_v41 }
  0xbf   : > { %v669_v46 = vadd.f32 %v649_v0, %v598_v38 }
  0xc3   : > { %v651_v9 = vpop.f32.mrf.mxu0 }
  0xc4   : > { %v580_v5 = vpop.f32.mrf.mxu3  ;;  %v428_v10 = vpop.f32.mrf.mxu1 }
  0xc5   : > { %v525_v12 = vpop.f32.mrf.mxu2  ;;  %v599_v14 = vadd.f32 %v580_v5, %v541_v44  ;;  %v429_v50 = vadd.f32 %v428_v10, %v1378_v59 }
  0xc6   : > { %v542_v51 = vadd.f32 %v525_v12, %v427_v15 }
  0xc7   : > { %v670_v55 = vadd.f32 %v651_v9, %v599_v14 }
  0xcb   : > { %v654_v18 = vpop.f32.mrf.mxu0 }
  0xcc   : > { %v583_v19 = vpop.f32.mrf.mxu3  ;;  %v1390_v22 = vpop.f32.mrf.mxu1 }
  0xcd   : > { %v527_v39 = vpop.f32.mrf.mxu2  ;;  %v600_v40 = vadd.f32 %v583_v19, %v542_v51  ;;  %v432_v21 = vadd.f32 %v1390_v22, %v1380_v62 }
  0xce   : > { %v543_v17 = vadd.f32 %v527_v39, %v429_v50 }
  0xcf   : > { %v671_v9 = vadd.f32 %v654_v18, %v600_v40 }
  0xd3   : > { %v1392_v45 = vpop.f32.mrf.mxu0 }
  0xd4   : > { %v585_v25 = vpop.f32.mrf.mxu3  ;;  %v1394_v57 = vpop.f32.mrf.mxu1 }
  0xd5   : > { %v1396_v26 = vpop.f32.mrf.mxu2  ;;  %v601_v10 = vadd.f32 %v585_v25, %v543_v17 }
  0xd6   : > { %v544_v39 = vadd.f32 %v1396_v26, %v432_v21  ;;  %v434_v26 = vadd.f32 %v1394_v57, %v1386_v29 }
  0xd7   : > { %v672_v44 = vadd.f32 %v1392_v45, %v601_v10 }
  0xdb   : > { %v1398_v27 = vpop.f32.mrf.mxu0 }
  0xdc   : > { %v1400_v56 = vpop.f32.mrf.mxu3  ;;  %v1402_v30 = vpop.f32.mrf.mxu1 }
  0xdd   : > { %v1404_v33 = vpop.f32.mrf.mxu2  ;;  %v602_v14 = vadd.f32 %v1400_v56, %v544_v39 }
  0xde   : > { %v545_v45 = vadd.f32 %v1404_v33, %v434_v26  ;;  %v437_v33 = vadd.f32 %v1402_v30, %v1383_v63 }
  0xdf   : > { %v673_v51 = vadd.f32 %v1398_v27, %v602_v14 }
  0xe3   : > { %v1406_v34 = vpop.f32.mrf.mxu0 }
  0xe4   : > { %v1408_v35 = vpop.f32.mrf.mxu3  ;;  %v1410_v20 = vpop.f32.mrf.mxu1 }
  0xe5   : > { %v1412_v47 = vpop.f32.mrf.mxu2 }
  0xe6   : > { %v546_v27 = vadd.f32 %v1412_v47, %v437_v33  ;;  %v439_v47 = vadd.f32 %v1410_v20, %v1388_v54 }
  0xeb   : > { %v1414_v36 = vpop.f32.mrf.mxu0 }
  0xec   : > { %v1416_v3 = vpop.f32.mrf.mxu3  ;;  %v711_v58 = vpop.f32.mrf.mxu1 }
  0xed   : > { %v1418_v28 = vpop.f32.mrf.mxu2  ;;  %v731_v13 = vadd.f32 %v711_v58, %v669_v46 }
  0xf3   : > { %v1420_v11 = vpop.f32.mrf.mxu0 }
  0xf4   : > { %v1422_v42 = vpop.f32.mrf.mxu3  ;;  %v713_v43 = vpop.f32.mrf.mxu1 }
  0xf5   : > { %v757_v31 = vpop.f32.mrf.mxu2  ;;  %v732_v23 = vadd.f32 %v713_v43, %v670_v55 }
  0xf6   : > { %v777_v48 = vadd.f32 %v757_v31, %v731_v13 }
  0xfb   : > { %v866_v16 = vpop.f32.mrf.mxu0 }
  0xfc   : > { %v816_v49 = vpop.f32.mrf.mxu3  ;;  %v716_v61 = vpop.f32.mrf.mxu1 }
  0xfd   : > { %v836_v52 = vadd.f32 %v816_v49, %v777_v48  ;;  %v759_v8 = vpop.f32.mrf.mxu2  ;;  %v733_v59 = vadd.f32 %v716_v61, %v671_v9 }
  0xfe   : > { %v778_v32 = vadd.f32 %v759_v8, %v732_v23 }
  0xff   : > { %v886_v60 = vadd.f32 %v866_v16, %v836_v52 }
 0x101   : > { %v898_v24 = vadd.f32 %v1428_v53, %v886_v60  ;;  %v603_v60 = vadd.f32 %v1408_v35, %v545_v45 }
 0x103   : > { %v868_v1 = vpop.f32.mrf.mxu0  ;;  %v906_v2 = vmax.f32 %v898_v24, 0.0  ;;  %v674_v50 = vadd.f32 %v1406_v34, %v603_v60  ;;  %v547_v34 = vadd.f32 %v1418_v28, %v439_v47 }
 0x104   : > { %v818_v4 = vpop.f32.mrf.mxu3  ;;  %v718_v0 = vpop.f32.mrf.mxu1 }
 0x105   : > { %v914_v6 = vpack.c.bf16 %v906_v2, %v906_v2  ;;  %v837_v7 = vadd.f32 %v818_v4, %v778_v32  ;;  %v762_v5 = vpop.f32.mrf.mxu2  ;;  %v734_v13 = vadd.f32 %v718_v0, %v672_v44  ;;  %v604_v0 = vadd.f32 %v1416_v3, %v546_v27 }
 0x106   : > { %v779_v37 = vadd.f32 %v762_v5, %v733_v59 }
 0x107   : > { %923 = vst.msk [vmem:[%s1436_s16] sm:$0xf] %vm922_vm9, %v914_v6  ;;  %v887_v12 = vadd.f32 %v868_v1, %v837_v7  ;;  %v675_v59 = vadd.f32 %v1414_v36, %v604_v0 }
 0x109   : > { %v899_v19 = vadd.f32 %v1428_v53, %v887_v12 }
 0x10b   : > { %v871_v58 = vpop.f32.mrf.mxu0  ;;  %v907_v38 = vmax.f32 %v899_v19, 0.0 }
 0x10c   : > { %v821_v41 = vpop.f32.mrf.mxu3  ;;  %v721_v31 = vpop.f32.mrf.mxu1 }
 0x10d   : > { %v915_v43 = vpack.c.bf16 %v907_v38, %v907_v38  ;;  %v838_v18 = vadd.f32 %v821_v41, %v779_v37  ;;  %v764_v46 = vpop.f32.mrf.mxu2  ;;  %v735_v55 = vadd.f32 %v721_v31, %v673_v51  ;;  %v605_v37 = vadd.f32 %v1422_v42, %v547_v34 }
 0x10e   : > { %v780_v62 = vadd.f32 %v764_v46, %v734_v13 }
 0x10f   : > { %924 = vst.msk [vmem:[%s1436_s16 + $0x4] sm:$0xf] %vm922_vm9, %v915_v43  ;;  %v888_v25 = vadd.f32 %v871_v58, %v838_v18  ;;  %v676_v36 = vadd.f32 %v1420_v11, %v605_v37 }
 0x111   : > { %v900_v48 = vadd.f32 %v1428_v53, %v888_v25 }
 0x113   : > { %v873_v22 = vpop.f32.mrf.mxu0  ;;  %v908_v16 = vmax.f32 %v900_v48, 0.0 }
 0x114   : > { %v823_v15 = vpop.f32.mrf.mxu3  ;;  %v723_v8 = vpop.f32.mrf.mxu1 }
 0x115   : > { %v916_v49 = vpack.c.bf16 %v908_v16, %v908_v16  ;;  %v839_v61 = vadd.f32 %v823_v15, %v780_v62  ;;  %v767_v52 = vpop.f32.mrf.mxu2  ;;  %v736_v4 = vadd.f32 %v723_v8, %v674_v50 }
 0x116   : > { %v781_v29 = vadd.f32 %v767_v52, %v735_v55 }
 0x117   : > { %925 = vst.msk [vmem:[%s1436_s16 + $0x8] sm:$0xf] %vm922_vm9, %v916_v49  ;;  %v889_v56 = vadd.f32 %v873_v22, %v839_v61 }
 0x119   : > { %v901_v23 = vadd.f32 %v1428_v53, %v889_v56 }
 0x11b   : > { %v876_v57 = vpop.f32.mrf.mxu0  ;;  %v909_v40 = vmax.f32 %v901_v23, 0.0 }
 0x11c   : > { %v826_v24 = vpop.f32.mrf.mxu3  ;;  %v726_v63 = vpop.f32.mrf.mxu1 }
 0x11d   : > { %v917_v32 = vpack.c.bf16 %v909_v40, %v909_v40  ;;  %v840_v1 = vadd.f32 %v826_v24, %v781_v29  ;;  %v769_v2 = vpop.f32.mrf.mxu2  ;;  %v737_v19 = vadd.f32 %v726_v63, %v675_v59 }
 0x11e   : > { %v782_v6 = vadd.f32 %v769_v2, %v736_v4 }
 0x11f   : > { %926 = vst.msk [vmem:[%s1436_s16 + $0xc] sm:$0xf] %vm922_vm9, %v917_v32  ;;  %v890_v35 = vadd.f32 %v876_v57, %v840_v1 }
 0x121   : > { %v902_v17 = vadd.f32 %v1428_v53, %v890_v35 }
 0x123   : > { %v878_v30 = vpop.f32.mrf.mxu0  ;;  %v910_v7 = vmax.f32 %v902_v17, 0.0 }
 0x124   : > { %v828_v9 = vpop.f32.mrf.mxu3  ;;  %v728_v20 = vpop.f32.mrf.mxu1 }
 0x125   : > { %v918_v5 = vpack.c.bf16 %v910_v7, %v910_v7  ;;  %v841_v12 = vadd.f32 %v828_v9, %v782_v6  ;;  %v772_v10 = vpop.f32.mrf.mxu2  ;;  %v738_v44 = vadd.f32 %v728_v20, %v676_v36 }
 0x126   : > { %v783_v21 = vadd.f32 %v772_v10, %v737_v19 }
 0x127   : > { %927 = vst.msk [vmem:[%s1436_s16 + $0x10] sm:$0xf] %vm922_vm9, %v918_v5  ;;  %v891_v3 = vadd.f32 %v878_v30, %v841_v12 }
 0x129   : > { %v903_v58 = vadd.f32 %v1428_v53, %v891_v3 }
 0x12b   : > { %v911_v54 = vmax.f32 %v903_v58, 0.0  ;;  %v881_v38 = vpop.f32.mrf.mxu0 }
 0x12c   : > { %v831_v28 = vpop.f32.mrf.mxu3 }
 0x12d   : > { %v919_v41 = vpack.c.bf16 %v911_v54, %v911_v54  ;;  %v842_v39 = vadd.f32 %v831_v28, %v783_v21  ;;  %v774_v43 = vpop.f32.mrf.mxu2 }
 0x12e   : > { %v784_v46 = vadd.f32 %v774_v43, %v738_v44 }
 0x12f   : > { %928 = vst.msk [vmem:[%s1436_s16 + $0x14] sm:$0xf] %vm922_vm9, %v919_v41  ;;  %v892_v18 = vadd.f32 %v881_v38, %v842_v39 }
 0x131   : > { %v904_v42 = vadd.f32 %v1428_v53, %v892_v18 }
 0x133   : > { %v912_v31 = vmax.f32 %v904_v42, 0.0  ;;  %v883_v48 = vpop.f32.mrf.mxu0 }
 0x134   : > { %v833_v25 = vpop.f32.mrf.mxu3 }
 0x135   : > { %v920_v13 = vpack.c.bf16 %v912_v31, %v912_v31  ;;  %v843_v14 = vadd.f32 %v833_v25, %v784_v46 }
 0x137   : > { %929 = vst.msk [vmem:[%s1436_s16 + $0x18] sm:$0xf] %vm922_vm9, %v920_v13  ;;  %v893_v62 = vadd.f32 %v883_v48, %v843_v14 }
 0x139   : > { %v905_v22 = vadd.f32 %v1428_v53, %v893_v62 }
 0x13b   : > { %v913_v11 = vmax.f32 %v905_v22, 0.0 }
 0x13d   : > { %v921_v26 = vpack.c.bf16 %v913_v11, %v913_v11 }
 0x13f   : > { %930 = vst.msk [vmem:[%s1436_s16 + $0x1c] sm:$0xf] %vm922_vm9, %v921_v26 }
 0x140 PF: > { %s13_s12 = sadd.s32 1, %s1063_s12  }
 0x141   : > { %p10_p4 = scmp.ge.s32.totalorder %s13_s12, 4  }
 0x143   :  { %12 = sbr.rel (!%p10_p4) target bundleno = 1 (0x1), region = 62 }

</bundles_post_ra>
